<compile_context>
chip_gen: v6e
topology: v6e:2x2x1
jax: 0.10.0
libtpu: 0.0.40
codegen_flags: <defaults>
</compile_context>

<pallas_src>
import jax
import jax.numpy as jnp
from jax.experimental import pallas as pl
from jax.experimental.pallas import tpu as pltpu


def _tokpos_kernel(x_ref, cls_ref, g1_ref, b1_ref, w_ref, bl_ref, g2_ref, b2_ref,
                   pos_ref, o_ref):
    """One token tile of one image.

    x_ref   : (tn, P)      raw patch rows (input dtype)
    cls_ref : (1, D)       cls_token + pos_embedding[0]  (f32)
    w_ref   : (P, D)       linear weight, bf16
    pos_ref : (tn, D)      pos_embedding rows for this token tile (f32)
    o_ref   : (N+1, D)     full token slab of this image (resident across j)
    """
    j = pl.program_id(1)
    tn = x_ref.shape[0]
    eps = 1e-5

    # CLS row (token 0) once per image.
    @pl.when(j == 0)
    def _():
        o_ref[pl.ds(0, 1), :] = cls_ref[...].astype(o_ref.dtype)

    x = x_ref[...].astype(jnp.float32)                     # (tn, P)

    # LayerNorm over P: single reduction pair (E[x], E[x^2]), rsqrt on the EUP.
    mu = jnp.mean(x, axis=-1, keepdims=True)
    ex2 = jnp.mean(x * x, axis=-1, keepdims=True)
    var = ex2 - mu * mu
    xn = (x - mu) * jax.lax.rsqrt(var + eps)
    xn = xn * g1_ref[...] + b1_ref[...]                    # (tn, P), f32

    # Linear P -> D on the MXU: bf16 operands, f32 accumulation.
    y = jnp.dot(xn.astype(jnp.bfloat16), w_ref[...],
                preferred_element_type=jnp.float32) + bl_ref[...]

    # LayerNorm over D.
    mu2 = jnp.mean(y, axis=-1, keepdims=True)
    ey2 = jnp.mean(y * y, axis=-1, keepdims=True)
    var2 = ey2 - mu2 * mu2
    yn = (y - mu2) * jax.lax.rsqrt(var2 + eps)
    yn = yn * g2_ref[...] + b2_ref[...]                    # (tn, D), f32

    # Add positional embedding and store into this image's resident slab at
    # token offset 1 + j*tn (token 0 is CLS).
    out = yn + pos_ref[...]
    o_ref[pl.ds(1 + j * tn, tn), :] = out.astype(o_ref.dtype)


def _pick_token_tile(N):
    """Largest divisor of N from {256,...,8} (sublane-friendly); fall back to N."""
    for t in (256, 128, 64, 32, 16, 8):
        if N % t == 0:
            return t
    return N


def tok_pos_embedding(image, params, patch_size):
    """Forward pass of TokPosEmbedding (eval mode: dropout == identity)."""
    b, c, H, W = image.shape
    p = patch_size
    h, w = H // p, W // p
    N = h * w
    P = c * p * p
    D = params["linear_w"].shape[1]

    # Rearrange 'b c (h p1) (w p2) -> b (h w) (p1 p2 c)'
    patches = image.reshape(b, c, h, p, w, p)
    patches = jnp.transpose(patches, (0, 2, 4, 3, 5, 1)).reshape(b, N, P)

    tn = _pick_token_tile(N)
    nj = N // tn

    g1 = params["ln1_g"].reshape(1, P).astype(jnp.float32)
    b1 = params["ln1_b"].reshape(1, P).astype(jnp.float32)
    wt = params["linear_w"].astype(jnp.bfloat16)           # bf16 weight from HBM
    bl = params["linear_b"].reshape(1, D).astype(jnp.float32)
    g2 = params["ln2_g"].reshape(1, D).astype(jnp.float32)
    b2 = params["ln2_b"].reshape(1, D).astype(jnp.float32)
    pos_patch = params["pos_embedding"][0, 1:N + 1].astype(jnp.float32)   # (N, D)
    cls_row = (params["cls_token"][0, 0]
               + params["pos_embedding"][0, 0]).reshape(1, D).astype(jnp.float32)

    # VMEM budget: double-buffered patch tile + resident output slab + bf16 weight
    # + pos tile + small params, with 2x headroom (capped for v7x's 64 MiB VMEM).
    itemsize = jnp.dtype(image.dtype).itemsize
    vmem_need = (2 * tn * P * itemsize
                 + 2 * (N + 1) * D * itemsize
                 + 2 * P * D * 2
                 + 2 * tn * D * 4
                 + 4 * (2 * P + 4 * D) * 4)
    vmem_limit = int(min(max(2 * vmem_need, 32 * 1024 * 1024), 64 * 1024 * 1024))

    out = pl.pallas_call(
        _tokpos_kernel,
        out_shape=jax.ShapeDtypeStruct((b, N + 1, D), image.dtype),
        grid=(b, nj),
        in_specs=[
            pl.BlockSpec((None, tn, P), lambda i, j: (i, j, 0)),   # patch tile
            pl.BlockSpec((1, D), lambda i, j: (0, 0)),             # cls + pos[0]
            pl.BlockSpec((1, P), lambda i, j: (0, 0)),             # ln1 gamma
            pl.BlockSpec((1, P), lambda i, j: (0, 0)),             # ln1 beta
            pl.BlockSpec((P, D), lambda i, j: (0, 0)),             # linear weight (bf16)
            pl.BlockSpec((1, D), lambda i, j: (0, 0)),             # linear bias
            pl.BlockSpec((1, D), lambda i, j: (0, 0)),             # ln2 gamma
            pl.BlockSpec((1, D), lambda i, j: (0, 0)),             # ln2 beta
            pl.BlockSpec((tn, D), lambda i, j: (j, 0)),            # pos rows for tile j
        ],
        # Output slab of one image stays resident across the j axis; CLS row is
        # written on j == 0, patch rows at offset 1 + j*tn -> no concat in glue.
        out_specs=pl.BlockSpec((None, N + 1, D), lambda i, j: (i, 0, 0)),
        compiler_params=pltpu.CompilerParams(
            dimension_semantics=("parallel", "arbitrary"),
            vmem_limit_bytes=vmem_limit),
    )(patches, cls_row, g1, b1, wt, bl, g2, b2, pos_patch)

    # TODO(synk): nn.Dropout is stochastic in train mode; eval mode is identity,
    # which is what we implement here.
    return out


def _reference(image, params, patch_size):
    """Pure-JAX f32 reference of the same forward pass for a sanity check."""
    b, c, H, W = image.shape
    p = patch_size
    h, w = H // p, W // p
    N = h * w
    P = c * p * p
    D = params["linear_w"].shape[1]
    eps = 1e-5

    patches = image.reshape(b, c, h, p, w, p)
    patches = jnp.transpose(patches, (0, 2, 4, 3, 5, 1)).reshape(b, N, P)

    def ln(x, g, bta):
        mu = jnp.mean(x, axis=-1, keepdims=True)
        var = jnp.mean((x - mu) ** 2, axis=-1, keepdims=True)
        return (x - mu) / jnp.sqrt(var + eps) * g + bta

    x = ln(patches, params["ln1_g"], params["ln1_b"])
    x = x @ params["linear_w"] + params["linear_b"]
    x = ln(x, params["ln2_g"], params["ln2_b"])
    cls = jnp.broadcast_to(params["cls_token"], (b, 1, D))
    x = jnp.concatenate([cls, x], axis=1)
    x = x + params["pos_embedding"][:, :N + 1]
    return x


def init_params(key, c, img_size, p, d_model):
    N = (img_size[0] // p) * (img_size[1] // p)
    P = c * p * p
    k_lin, k_bias, k_cls, k_pos = jax.random.split(key, 4)
    bound = 1.0 / jnp.sqrt(P)
    return {
        # LayerNorm defaults: gamma=1, beta=0
        "ln1_g": jnp.ones((P,), jnp.float32),
        "ln1_b": jnp.zeros((P,), jnp.float32),
        # nn.Linear(P, D): store weight transposed as (P, D)
        "linear_w": jax.random.uniform(k_lin, (P, d_model), jnp.float32,
                                       minval=-bound, maxval=bound),
        "linear_b": jax.random.uniform(k_bias, (d_model,), jnp.float32,
                                       minval=-bound, maxval=bound),
        "ln2_g": jnp.ones((d_model,), jnp.float32),
        "ln2_b": jnp.zeros((d_model,), jnp.float32),
        # torch.randn inits
        "cls_token": jax.random.normal(k_cls, (1, 1, d_model), jnp.float32),
        "pos_embedding": jax.random.normal(k_pos, (1, N + 1, d_model), jnp.float32),
        # NOTE: self.posEmbedding = nn.Embedding(100, d_model) is never used in
        # forward(), so it is intentionally omitted.
    }


if __name__ == "__main__":
    # Small config consistent with the module: c=4, img=16x16, patch=4, d_model=32
    c, img_size, p, d_model = 4, (16, 16), 4, 32
    batch = 2

    key = jax.random.PRNGKey(0)
    k_img, k_params = jax.random.split(key)
    image = jax.random.normal(k_img, (batch, c, img_size[0], img_size[1]),
                              jnp.float32)
    params = init_params(k_params, c, img_size, p, d_model)

    out = tok_pos_embedding(image, params, p)
    out = jax.block_until_ready(out)

    ref = _reference(image, params, p)
    assert out.shape == (batch, (img_size[0] // p) * (img_size[1] // p) + 1, d_model)
    # Tolerance accounts for bf16 matmul operands (f32 accumulation) vs f32 reference.
    assert jnp.allclose(out, ref, atol=3e-2, rtol=3e-2), \
        f"max abs diff {jnp.max(jnp.abs(out - ref))}"

    print("KERNEL_OK")
</pallas_src>

<mosaic_0001>
module attributes {stable_mosaic.version = 11 : i64} {
  func.func @_tokpos_kernel(%arg0: i32, %arg1: i32, %arg2: memref<1x16x64xf32, #tpu.memory_space<vmem>>, %arg3: memref<1x32xf32, #tpu.memory_space<vmem>>, %arg4: memref<1x64xf32, #tpu.memory_space<vmem>>, %arg5: memref<1x64xf32, #tpu.memory_space<vmem>>, %arg6: memref<64x32xbf16, #tpu.memory_space<vmem>>, %arg7: memref<1x32xf32, #tpu.memory_space<vmem>>, %arg8: memref<1x32xf32, #tpu.memory_space<vmem>>, %arg9: memref<1x32xf32, #tpu.memory_space<vmem>>, %arg10: memref<16x32xf32, #tpu.memory_space<vmem>>, %arg11: memref<1x17x32xf32, #tpu.memory_space<vmem>>) attributes {dimension_semantics = [#tpu.dimension_semantics<parallel>, #tpu.dimension_semantics<arbitrary>], iteration_bounds = array<i64: 2, 1>, scalar_prefetch = 0 : i64, scratch_operands = 0 : i64, tpu.core_type = #tpu.core_type<tc>, window_params = [{transform_indices = @transform_0, window_bounds = array<i64: 1, 16, 64>}, {pipeline_mode = #tpu.pipeline_mode<synchronous>, transform_indices = @transform_1, window_bounds = array<i64: 1, 32>}, {pipeline_mode = #tpu.pipeline_mode<synchronous>, transform_indices = @transform_2, window_bounds = array<i64: 1, 64>}, {pipeline_mode = #tpu.pipeline_mode<synchronous>, transform_indices = @transform_3, window_bounds = array<i64: 1, 64>}, {pipeline_mode = #tpu.pipeline_mode<synchronous>, transform_indices = @transform_4, window_bounds = array<i64: 64, 32>}, {pipeline_mode = #tpu.pipeline_mode<synchronous>, transform_indices = @transform_5, window_bounds = array<i64: 1, 32>}, {pipeline_mode = #tpu.pipeline_mode<synchronous>, transform_indices = @transform_6, window_bounds = array<i64: 1, 32>}, {pipeline_mode = #tpu.pipeline_mode<synchronous>, transform_indices = @transform_7, window_bounds = array<i64: 1, 32>}, {transform_indices = @transform_8, window_bounds = array<i64: 16, 32>}, {transform_indices = @transform_9, window_bounds = array<i64: 1, 17, 32>}]} {
    %c0_i32 = arith.constant 0 : i32
    %0 = arith.cmpi eq, %arg1, %c0_i32 : i32
    %1 = arith.extui %0 : i1 to i32
    %c0_i32_0 = arith.constant 0 : i32
    %2 = arith.cmpi ne, %1, %c0_i32_0 : i32
    scf.if %2 {
      %c0_29 = arith.constant 0 : index
      %c0_30 = arith.constant 0 : index
      %67 = vector.load %arg3[%c0_29, %c0_30] : memref<1x32xf32, #tpu.memory_space<vmem>>, vector<1x32xf32>
      %c0_31 = arith.constant 0 : index
      %c0_32 = arith.constant 0 : index
      %c0_33 = arith.constant 0 : index
      %68 = vector.load %arg11[%c0_31, %c0_32, %c0_33] : memref<1x17x32xf32, #tpu.memory_space<vmem>>, vector<1x1x32xf32>
      %69 = vector.shape_cast %68 : vector<1x1x32xf32> to vector<1x32xf32>
      %70 = vector.shape_cast %67 : vector<1x32xf32> to vector<1x1x32xf32>
      tpu.vector_store %arg11[%c0_31, %c0_32, %c0_33], %70 {strides = array<i32>} : memref<1x17x32xf32, #tpu.memory_space<vmem>>, vector<1x1x32xf32>,
    } else {
    }
    %c0 = arith.constant 0 : index
    %c0_1 = arith.constant 0 : index
    %c0_2 = arith.constant 0 : index
    %3 = vector.load %arg2[%c0, %c0_1, %c0_2] : memref<1x16x64xf32, #tpu.memory_space<vmem>>, vector<1x16x64xf32>
    %4 = vector.shape_cast %3 : vector<1x16x64xf32> to vector<16x64xf32>
    %cst = arith.constant dense<0.000000e+00> : vector<16xf32>
    %5 = vector.multi_reduction <add>, %4, %cst [1] : vector<16x64xf32> to vector<16xf32>
    %6 = vector.shape_cast %5 : vector<16xf32> to vector<16x1xf32>
    %cst_3 = arith.constant 6.400000e+01 : f32
    %7 = vector.broadcast %cst_3 : f32 to vector<16x1xf32>
    %8 = arith.divf %6, %7 : vector<16x1xf32>
    %9 = arith.mulf %4, %4 : vector<16x64xf32>
    %cst_4 = arith.constant dense<0.000000e+00> : vector<16xf32>
    %10 = vector.multi_reduction <add>, %9, %cst_4 [1] : vector<16x64xf32> to vector<16xf32>
    %11 = vector.shape_cast %10 : vector<16xf32> to vector<16x1xf32>
    %cst_5 = arith.constant 6.400000e+01 : f32
    %12 = vector.broadcast %cst_5 : f32 to vector<16x1xf32>
    %13 = arith.divf %11, %12 : vector<16x1xf32>
    %14 = arith.mulf %8, %8 : vector<16x1xf32>
    %15 = arith.subf %13, %14 : vector<16x1xf32>
    %16 = vector.broadcast %8 : vector<16x1xf32> to vector<16x64xf32>
    %17 = arith.subf %4, %16 : vector<16x64xf32>
    %cst_6 = arith.constant 9.99999974E-6 : f32
    %18 = vector.broadcast %cst_6 : f32 to vector<16x1xf32>
    %19 = arith.addf %15, %18 : vector<16x1xf32>
    %20 = math.rsqrt %19 : vector<16x1xf32>
    %21 = vector.broadcast %20 : vector<16x1xf32> to vector<16x64xf32>
    %22 = arith.mulf %17, %21 : vector<16x64xf32>
    %c0_7 = arith.constant 0 : index
    %c0_8 = arith.constant 0 : index
    %23 = vector.load %arg4[%c0_7, %c0_8] : memref<1x64xf32, #tpu.memory_space<vmem>>, vector<1x64xf32>
    %24 = vector.broadcast %23 : vector<1x64xf32> to vector<16x64xf32>
    %25 = arith.mulf %22, %24 : vector<16x64xf32>
    %c0_9 = arith.constant 0 : index
    %c0_10 = arith.constant 0 : index
    %26 = vector.load %arg5[%c0_9, %c0_10] : memref<1x64xf32, #tpu.memory_space<vmem>>, vector<1x64xf32>
    %27 = vector.broadcast %26 : vector<1x64xf32> to vector<16x64xf32>
    %28 = arith.addf %25, %27 : vector<16x64xf32>
    %29 = arith.truncf %28 : vector<16x64xf32> to vector<16x64xbf16>
    %c0_11 = arith.constant 0 : index
    %c0_12 = arith.constant 0 : index
    %30 = vector.load %arg6[%c0_11, %c0_12] : memref<64x32xbf16, #tpu.memory_space<vmem>>, vector<64x32xbf16>
    %cst_13 = arith.constant dense<0.000000e+00> : vector<16x32xf32>
    %31 = tpu.matmul %29, %30, %cst_13 {dimension_numbers = #tpu.dot_dimension_numbers<[1], [0], [0], [1], [0, 0, 1, 1], [], []>} : vector<16x64xbf16>, vector<64x32xbf16>, vector<16x32xf32> -> vector<16x32xf32>
    %c0_14 = arith.constant 0 : index
    %c0_15 = arith.constant 0 : index
    %32 = vector.load %arg7[%c0_14, %c0_15] : memref<1x32xf32, #tpu.memory_space<vmem>>, vector<1x32xf32>
    %33 = vector.broadcast %32 : vector<1x32xf32> to vector<16x32xf32>
    %34 = arith.addf %31, %33 : vector<16x32xf32>
    %cst_16 = arith.constant dense<0.000000e+00> : vector<16xf32>
    %35 = vector.multi_reduction <add>, %34, %cst_16 [1] : vector<16x32xf32> to vector<16xf32>
    %36 = vector.shape_cast %35 : vector<16xf32> to vector<16x1xf32>
    %cst_17 = arith.constant 3.200000e+01 : f32
    %37 = vector.broadcast %cst_17 : f32 to vector<16x1xf32>
    %38 = arith.divf %36, %37 : vector<16x1xf32>
    %39 = arith.mulf %34, %34 : vector<16x32xf32>
    %cst_18 = arith.constant dense<0.000000e+00> : vector<16xf32>
    %40 = vector.multi_reduction <add>, %39, %cst_18 [1] : vector<16x32xf32> to vector<16xf32>
    %41 = vector.shape_cast %40 : vector<16xf32> to vector<16x1xf32>
    %cst_19 = arith.constant 3.200000e+01 : f32
    %42 = vector.broadcast %cst_19 : f32 to vector<16x1xf32>
    %43 = arith.divf %41, %42 : vector<16x1xf32>
    %44 = arith.mulf %38, %38 : vector<16x1xf32>
    %45 = arith.subf %43, %44 : vector<16x1xf32>
    %46 = vector.broadcast %38 : vector<16x1xf32> to vector<16x32xf32>
    %47 = arith.subf %34, %46 : vector<16x32xf32>
    %cst_20 = arith.constant 9.99999974E-6 : f32
    %48 = vector.broadcast %cst_20 : f32 to vector<16x1xf32>
    %49 = arith.addf %45, %48 : vector<16x1xf32>
    %50 = math.rsqrt %49 : vector<16x1xf32>
    %51 = vector.broadcast %50 : vector<16x1xf32> to vector<16x32xf32>
    %52 = arith.mulf %47, %51 : vector<16x32xf32>
    %c0_21 = arith.constant 0 : index
    %c0_22 = arith.constant 0 : index
    %53 = vector.load %arg8[%c0_21, %c0_22] : memref<1x32xf32, #tpu.memory_space<vmem>>, vector<1x32xf32>
    %54 = vector.broadcast %53 : vector<1x32xf32> to vector<16x32xf32>
    %55 = arith.mulf %52, %54 : vector<16x32xf32>
    %c0_23 = arith.constant 0 : index
    %c0_24 = arith.constant 0 : index
    %56 = vector.load %arg9[%c0_23, %c0_24] : memref<1x32xf32, #tpu.memory_space<vmem>>, vector<1x32xf32>
    %57 = vector.broadcast %56 : vector<1x32xf32> to vector<16x32xf32>
    %58 = arith.addf %55, %57 : vector<16x32xf32>
    %c0_25 = arith.constant 0 : index
    %c0_26 = arith.constant 0 : index
    %59 = vector.load %arg10[%c0_25, %c0_26] : memref<16x32xf32, #tpu.memory_space<vmem>>, vector<16x32xf32>
    %60 = arith.addf %58, %59 : vector<16x32xf32>
    %c16_i32 = arith.constant 16 : i32
    %61 = arith.muli %arg1, %c16_i32 : i32
    %c1_i32 = arith.constant 1 : i32
    %62 = arith.addi %c1_i32, %61 : i32
    %c0_27 = arith.constant 0 : index
    %63 = arith.index_cast %62 : i32 to index
    %c0_28 = arith.constant 0 : index
    %64 = vector.load %arg11[%c0_27, %63, %c0_28] : memref<1x17x32xf32, #tpu.memory_space<vmem>>, vector<1x16x32xf32>
    %65 = vector.shape_cast %64 : vector<1x16x32xf32> to vector<16x32xf32>
    %66 = vector.shape_cast %60 : vector<16x32xf32> to vector<1x16x32xf32>
    tpu.vector_store %arg11[%c0_27, %63, %c0_28], %66 {strides = array<i32>} : memref<1x17x32xf32, #tpu.memory_space<vmem>>, vector<1x16x32xf32>,
    return
  }
  func.func @transform_0(%arg0: i32, %arg1: i32) -> (i32, i32, i32) {
    %c0_i32 = arith.constant 0 : i32
    %c0_i32_0 = arith.constant 0 : i32
    return %arg0, %arg1, %c0_i32 : i32, i32, i32
  }
  func.func @transform_1(%arg0: i32, %arg1: i32) -> (i32, i32) {
    %c0_i32 = arith.constant 0 : i32
    %c0_i32_0 = arith.constant 0 : i32
    %c0_i32_1 = arith.constant 0 : i32
    return %c0_i32, %c0_i32_0 : i32, i32
  }
  func.func @transform_2(%arg0: i32, %arg1: i32) -> (i32, i32) {
    %c0_i32 = arith.constant 0 : i32
    %c0_i32_0 = arith.constant 0 : i32
    %c0_i32_1 = arith.constant 0 : i32
    return %c0_i32, %c0_i32_0 : i32, i32
  }
  func.func @transform_3(%arg0: i32, %arg1: i32) -> (i32, i32) {
    %c0_i32 = arith.constant 0 : i32
    %c0_i32_0 = arith.constant 0 : i32
    %c0_i32_1 = arith.constant 0 : i32
    return %c0_i32, %c0_i32_0 : i32, i32
  }
  func.func @transform_4(%arg0: i32, %arg1: i32) -> (i32, i32) {
    %c0_i32 = arith.constant 0 : i32
    %c0_i32_0 = arith.constant 0 : i32
    %c0_i32_1 = arith.constant 0 : i32
    return %c0_i32, %c0_i32_0 : i32, i32
  }
  func.func @transform_5(%arg0: i32, %arg1: i32) -> (i32, i32) {
    %c0_i32 = arith.constant 0 : i32
    %c0_i32_0 = arith.constant 0 : i32
    %c0_i32_1 = arith.constant 0 : i32
    return %c0_i32, %c0_i32_0 : i32, i32
  }
  func.func @transform_6(%arg0: i32, %arg1: i32) -> (i32, i32) {
    %c0_i32 = arith.constant 0 : i32
    %c0_i32_0 = arith.constant 0 : i32
    %c0_i32_1 = arith.constant 0 : i32
    return %c0_i32, %c0_i32_0 : i32, i32
  }
  func.func @transform_7(%arg0: i32, %arg1: i32) -> (i32, i32) {
    %c0_i32 = arith.constant 0 : i32
    %c0_i32_0 = arith.constant 0 : i32
    %c0_i32_1 = arith.constant 0 : i32
    return %c0_i32, %c0_i32_0 : i32, i32
  }
  func.func @transform_8(%arg0: i32, %arg1: i32) -> (i32, i32) {
    %c0_i32 = arith.constant 0 : i32
    %c0_i32_0 = arith.constant 0 : i32
    return %arg1, %c0_i32 : i32, i32
  }
  func.func @transform_9(%arg0: i32, %arg1: i32) -> (i32, i32, i32) {
    %c0_i32 = arith.constant 0 : i32
    %c0_i32_0 = arith.constant 0 : i32
    %c0_i32_1 = arith.constant 0 : i32
    return %arg0, %c0_i32, %c0_i32_0 : i32, i32, i32
  }
}

</mosaic_0001>

<bundles_post_ra>
// kernel: tpu_custom_call.1
= control target key start
LH: loop header
LB: loop body
LE: loop exit
PB: predicated region body
PF: predicated region fallthrough
CT: control target
= control target key end

     0   :  { %s830_s30 = smov 0   ;;  %s832_s10 = smov 0   ;;  %s915_s0 = inlined_call_operand.vmem [shape: f32[2,16,64], index: 0, kind: input, shape index: {}]   ;;  %s916_s1 = inlined_call_operand.vmem [shape: f32[1,32], index: 1, kind: input, shape index: {}]   ;;  %s917_s2 = inlined_call_operand.vmem [shape: f32[1,64], index: 2, kind: input, shape index: {}]   ;;  %s918_s3 = inlined_call_operand.vmem [shape: f32[1,64], index: 3, kind: input, shape index: {}]   ;;  %s919_s4 = inlined_call_operand.vmem [shape: bf16[64,32], index: 4, kind: input, shape index: {}]   ;;  %s920_s5 = inlined_call_operand.vmem [shape: f32[1,32], index: 5, kind: input, shape index: {}]   ;;  %s921_s6 = inlined_call_operand.vmem [shape: f32[1,32], index: 6, kind: input, shape index: {}]   ;;  %s922_s7 = inlined_call_operand.vmem [shape: f32[1,32], index: 7, kind: input, shape index: {}]   ;;  %s923_s8 = inlined_call_operand.vmem [shape: f32[16,32], index: 8, kind: input, shape index: {}]   ;;  %s924_s9 = inlined_call_operand.vmem [shape: f32[2,17,32], index: 9, kind: output, shape index: {}]  }
   0x1   :  { %s834_s11 = smov 0  }
   0x2 LB: > { %s31_s12 = sadd.s32 1, %s772_s10  ;;  %p679_p0 = scmp.ge.s32.totalorder %s776_s11, 1  ;;  %s776_s11 = sphi %s834_s11, %s19_s11   ;;  %s772_s10 = sphi %s832_s10, %s926_s10   ;;  %s768_s30 = sphi %s830_s30, %s925_s30  }
   0x3   : > { %p33_p1 = scmp.ge.s32.totalorder %s31_s12, 2  ;;  %p317_p2 = scmp.lt.s32.totalorder %s776_s11, 3 }
   0x5   : > { %s928_s12 = smov (%p33_p1, %s31_s12), 0  ;;  %p318_p3 = pnand %p679_p0, %p317_p2 }
   0x6   : > { %p363_p4 = scmp.lt.s32.totalorder (!%p318_p3), %s768_s30, 1 }
   0x7   : > { %321 = sbr.rel (%p318_p3) target bundleno = 560 (0x230), region = 56 }
   0xc   : > { %s930_s30 = smov (!%p363_p4, %s768_s30), 1  ;;  %v388_v0 = vld [vmem:[%s916_s1] sm:$0x1]  ;;  %vm389_vm0 = vcmask 253952   ;;  %vm393_vm1 = vcmask 523264   ;;  %v742_v9 = vld [vmem:[%s919_s4 + $0x18] sm:$0xff]  }
   0xd   : > { %s697_s13 = sshll.u32 %s930_s30, 4  ;;  %s715_s14 = smul.u32 24, %s930_s30  ;;  %v778_v10 = vmov 0.0   ;;  %vm779_vm2 = vmmov 0   ;;  %v743_v11 = vld [vmem:[%s919_s4 + $0x10] sm:$0xff]   ;;  %v744_v12 = vld [vmem:[%s919_s4 + $0x8] sm:$0xff]  }
   0xe   : > { %s370_s19 = scalar_lea.vmem %s915_s0, %s697_s13  ;;  %703 = vmatprep.subr.bf16.mxu0 %v778_v10  ;;  %711 = vmatprep.mubr.msk.bf16.mxu0 %vm779_vm2, %v778_v10  ;;  %v745_v13 = vld [vmem:[%s919_s4] sm:$0xff]   ;;  %vm527_vm3 = vcmask 261120  }
   0xf   : > { %s857_s22 = scalar_lea.vmem %s924_s9, %s715_s14  ;;  %v391_v1 = vld [vmem:[%s370_s19] sm:$0xff]  ;;  %v392_v2 = vld [vmem:[%s370_s19 + $0x8] sm:$0xff]  ;;  %704 = vmatpush3.bf16.msra.mxu0 %v742_v9 }
  0x10   : > { %390 = vst.msk [vmem:[%s857_s22] sm:$0x1] %vm389_vm0, %v388_v0  ;;  %v394_v3 = vsel %vm393_vm1, %v391_v1, 0.0  ;;  %v403_v4 = vmul.f32 %v391_v1, %v391_v1  ;;  %v404_v5 = vmul.f32 %v392_v2, %v392_v2  ;;  %v397_v7 = vsel %vm393_vm1, %v392_v2, 0.0  ;;  %705 = vmatprep.subr.bf16.mxu0 %v778_v10  ;;  %v683_v31 = vld [vmem:[%s917_s2] ss:$0 sm:$0xff] }
  0x11   : > { %395 = vadd.xlane.f32.xlu0 %v394_v3  ;;  %v684_v36 = vld [vmem:[%s918_s3] ss:$0 sm:$0xff] }
  0x12   : > { %v405_v6 = vsel %vm393_vm1, %v403_v4, 0.0  ;;  %v408_v8 = vsel %vm393_vm1, %v404_v5, 0.0  ;;  %v685_v41 = vld [vmem:[%s920_s5] ss:$0 sm:$0xff] }
  0x13   : > { %406 = vadd.xlane.f32.xlu1 %v405_v6  ;;  %706 = vmatpush3.bf16.msra.mxu0 %v743_v11  ;;  %v691_v6 = vld [vmem:[%s921_s6] ss:$0 sm:$0xff] }
  0x14   : > { %707 = vmatprep.subr.bf16.mxu0 %v778_v10 }
  0x15   : > { %398 = vadd.xlane.f32.xlu0 %v397_v7 }
  0x17   : > { %409 = vadd.xlane.f32.xlu1 %v408_v8  ;;  %708 = vmatpush3.bf16.msra.mxu0 %v744_v12  ;;  %v692_v8 = vld [vmem:[%s922_s7] ss:$0 sm:$0xff] }
  0x18   : > { %709 = vmatprep.subr.bf16.mxu0 %v778_v10  ;;  %v577_v12 = vld [vmem:[%s923_s8] sm:$0xff] }
  0x1b   : > { %710 = vmatpush3.bf16.msra.mxu0 %v745_v13 }
  0x9a   : > { %v396_v14 = vpop.xlane.xlu0 %395 }
  0x9b   : > { %v401_v15 = vmul.f32 0.015625, %v396_v14 }
  0x9c   : > { %v407_v16 = vpop.xlane.xlu1 %406 }
  0x9d   : > { %v413_v17 = vmul.f32 %v401_v15, %v401_v15  ;;  %v411_v18 = vmul.f32 0.015625, %v407_v16  ;;  %v417_v28 = vsub.f32 %v391_v1, %v401_v15 }
  0x9e   : > { %v399_v19 = vpop.xlane.xlu0 %398 }
  0x9f   : > { %v415_v20 = vsub.f32 %v411_v18, %v413_v17  ;;  %v402_v21 = vmul.f32 0.015625, %v399_v19  ;;  %v578_v17 = vld [vmem:[%s923_s8 + $0x8] sm:$0xff] }
  0xa0   : > { %v410_v22 = vpop.xlane.xlu1 %409 }
  0xa1   : > { %v419_v23 = vadd.f32 1e-05, %v415_v20  ;;  %v414_v24 = vmul.f32 %v402_v21, %v402_v21  ;;  %v412_v25 = vmul.f32 0.015625, %v410_v22  ;;  %v418_v32 = vsub.f32 %v392_v2, %v402_v21 }
  0xa3   : > { %746 = vrsqrt.f32 %v419_v23  ;;  %v416_v26 = vsub.f32 %v412_v25, %v414_v24 }
  0xa5   : > { %v420_v27 = vadd.f32 1e-05, %v416_v26 }
  0xa7   : > { %748 = vrsqrt.f32 %v420_v27 }
  0xb0   : > { %v747_v29 = vpop.eup %746 }
  0xb1   : > { %v423_v30 = vmul.f32 %v747_v29, %v417_v28 }
  0xb3   : > { %v432_v35 = vmul.f32 %v683_v31, %v423_v30 }
  0xb4   : > { %v749_v33 = vpop.eup %748 }
  0xb5   : > { %v424_v34 = vmul.f32 %v749_v33, %v418_v32  ;;  %v441_v38 = vadd.f32 %v684_v36, %v432_v35 }
  0xb7   : > { %v433_v37 = vmul.f32 %v683_v31, %v424_v34 }
  0xb9   : > { %v442_v39 = vadd.f32 %v684_v36, %v433_v37 }
  0xbb   : > { %v443_v40 = vpack.c.bf16 %v442_v39, %v441_v38 }
  0xbd   : > { %712 = vmatmul.mubr.msk.bf16.vlgmr.msra.gmra.mxu0 %vm393_vm1, %v443_v40 }
 0x17d   : > { %v520_v42 = vpop.f32.mrf.mxu0 }
 0x17e   : > { %v521_v43 = vadd.f32 %v685_v41, %v520_v42 }
 0x17f   : > { %v713_v44 = vpop.f32.mrf.mxu0 }
 0x180   : > { %v528_v45 = vsel %vm527_vm3, %v521_v43, 0.0  ;;  %v537_v46 = vmul.f32 %v521_v43, %v521_v43 }
 0x181   : > { %529 = vadd.xlane.f32.xlu0 %v528_v45  ;;  %v523_v47 = vpop.f32.mrf.mxu0 }
 0x182   : > { %v524_v48 = vadd.f32 %v685_v41, %v523_v47  ;;  %v539_v50 = vsel %vm527_vm3, %v537_v46, 0.0 }
 0x183   : > { %v714_v49 = vpop.f32.mrf.mxu0 }
 0x184   : > { %v531_v51 = vsel %vm527_vm3, %v524_v48, 0.0  ;;  %v538_v52 = vmul.f32 %v524_v48, %v524_v48 }
 0x185   : > { %540 = vadd.xlane.f32.xlu0 %v539_v50  ;;  %532 = vadd.xlane.f32.xlu1 %v531_v51 }
 0x186   : > { %v542_v53 = vsel %vm527_vm3, %v538_v52, 0.0 }
 0x189   : > { %543 = vadd.xlane.f32.xlu1 %v542_v53 }
 0x20a   : > { %v530_v54 = vpop.xlane.xlu0 %529 }
 0x20b   : > { %v535_v55 = vmul.f32 0.03125, %v530_v54 }
 0x20d   : > { %v547_v58 = vmul.f32 %v535_v55, %v535_v55  ;;  %v551_v4 = vsub.f32 %v521_v43, %v535_v55 }
 0x20e   : > { %v541_v56 = vpop.xlane.xlu0 %540  ;;  %v533_v57 = vpop.xlane.xlu1 %532 }
 0x20f   : > { %v545_v59 = vmul.f32 0.03125, %v541_v56  ;;  %v536_v60 = vmul.f32 0.03125, %v533_v57 }
 0x211   : > { %v549_v61 = vsub.f32 %v545_v59, %v547_v58  ;;  %v548_v0 = vmul.f32 %v536_v60, %v536_v60  ;;  %v552_v10 = vsub.f32 %v524_v48, %v536_v60 }
 0x212   : > { %v544_v62 = vpop.xlane.xlu1 %543 }
 0x213   : > { %v553_v63 = vadd.f32 1e-05, %v549_v61  ;;  %v546_v1 = vmul.f32 0.03125, %v544_v62 }
 0x215   : > { %750 = vrsqrt.f32 %v553_v63  ;;  %v550_v2 = vsub.f32 %v546_v1, %v548_v0 }
 0x217   : > { %v554_v3 = vadd.f32 1e-05, %v550_v2 }
 0x219   : > { %752 = vrsqrt.f32 %v554_v3 }
 0x222   : > { %v751_v5 = vpop.eup %750 }
 0x223   : > { %v557_v7 = vmul.f32 %v751_v5, %v551_v4 }
 0x225   : > { %v566_v9 = vmul.f32 %v691_v6, %v557_v7 }
 0x226   : > { %v753_v11 = vpop.eup %752 }
 0x227   : > { %v575_v13 = vadd.f32 %v692_v8, %v566_v9  ;;  %v558_v14 = vmul.f32 %v753_v11, %v552_v10 }
 0x229   : > { %v579_v15 = vadd.f32 %v577_v12, %v575_v13  ;;  %v567_v16 = vmul.f32 %v691_v6, %v558_v14 }
 0x22b   : > { %693 = vst.msk [vmem:[%s857_s22 + $0x1] sm:$0xff] %vm527_vm3, %v579_v15  ;;  %v576_v18 = vadd.f32 %v692_v8, %v567_v16 }
 0x22d   : > { %v580_v19 = vadd.f32 %v578_v17, %v576_v18 }
 0x22f   : > { %694 = vst.msk [vmem:[%s857_s22 + $0x9] sm:$0xff] %vm527_vm3, %v580_v19 }
 0x230 PF: > { %s19_s11 = sadd.s32 1, %s776_s11   ;;  %s925_s30 = smov %s772_s10 }
 0x231   : > { %p16_p5 = scmp.ge.s32.totalorder %s19_s11, 4   ;;  %s926_s10 = smov %s928_s12 }
 0x233   :  { %18 = sbr.rel (!%p16_p5) target bundleno = 2 (0x2), region = 94 }

</bundles_post_ra>
